<compile_context>
chip_gen: v7x
topology: tpu7x:2x2x1
jax: 0.10.0
libtpu: 0.0.40
codegen_flags: <defaults>
</compile_context>

<pallas_src>
import jax
import jax.numpy as jnp
from jax.experimental import pallas as pl
from jax.experimental.pallas import tpu as pltpu

LANES = 128


def _round_up(n, m):
    return ((n + m - 1) // m) * m


# --------------------------------------------------------------------------- #
# Kernel
# --------------------------------------------------------------------------- #
def make_enn_kernel(D_in, h1, h2, o_bus, o_E, o_A, row_offs):
    """All sizes / slab row offsets are Python-static."""
    r_in, r_out, r_be, r_A = row_offs
    o12 = o_bus + o_E

    def kernel(x_ref, w_ref, b_ref, out_ref):
        cdt = jnp.bfloat16                        # MXU compute dtype
        x = x_ref[...].astype(cdt)                # no-op if caller supplies bf16

        # Static slices of the packed bf16 weight slab ([in, out] layout) and
        # the packed f32 bias slab (one row per layer).
        w_in = w_ref[r_in:r_in + D_in, :h1]
        w_out = w_ref[r_out:r_out + h1, :h2]
        w_be = w_ref[r_be:r_be + h2, :o12]        # [w_bus | w_E] fused
        w_A = w_ref[r_A:r_A + o12, :o_A]
        b_in = b_ref[0:1, :h1]
        b_out = b_ref[1:2, :h2]
        b_be = b_ref[2:3, :o12]                   # [b_bus | b_E]
        b_A = b_ref[3:4, :o_A]

        # x = dropout(relu(layer_input(x)))       -- dropout = identity (eval)
        # TODO(synk): nn.Dropout implemented as identity (inference mode).
        h = jnp.dot(x, w_in, preferred_element_type=jnp.float32) + b_in
        h = jnp.maximum(h, 0.0).astype(cdt)

        # x0 = dropout(relu(layer_output(x)))
        x0 = jnp.dot(h, w_out, preferred_element_type=jnp.float32) + b_out
        x0 = jnp.maximum(x0, 0.0).astype(cdt)

        # Fused business/ethics_E:  [x1 | x2_pre] = x0 @ [w_bus | w_E] + bias
        xc = jnp.dot(x0, w_be, preferred_element_type=jnp.float32) + b_be
        # ReLU only the ethics_E lanes (x2); layer_business (x1) stays linear.
        lane = jax.lax.broadcasted_iota(jnp.int32, xc.shape, dimension=1)
        xc = jnp.where(lane >= o_bus, jnp.maximum(xc, 0.0), xc)

        # x3 = dropout(layer_ethics_A(cat([x1, x2], 1)))
        x3 = jnp.dot(xc.astype(cdt), w_A, preferred_element_type=jnp.float32) + b_A

        # Two static sliced stores (no lane concat through the XLU).
        out_ref[:, :o12] = xc.astype(out_ref.dtype)
        out_ref[:, o12:o12 + o_A] = x3.astype(out_ref.dtype)

    return kernel


# --------------------------------------------------------------------------- #
# Param packing
# --------------------------------------------------------------------------- #
def prepare_params(params):
    """Fuse bus/E, pack all weights into one bf16 slab and all biases into one
    (8, 128) f32 slab -> only 2 resident-weight DMA streams per launch."""
    w_in, w_out = params["w_in"], params["w_out"]
    w_bus, w_E, w_A = params["w_bus"], params["w_E"], params["w_A"]
    D_in, h1 = w_in.shape
    h2 = w_out.shape[1]
    o_bus, o_E, o_A = w_bus.shape[1], w_E.shape[1], w_A.shape[1]
    o12 = o_bus + o_E
    assert w_out.shape[0] == h1
    assert w_bus.shape[0] == h2 and w_E.shape[0] == h2
    assert w_A.shape[0] == o12
    for width in (h1, h2, o12, o_A):
        assert width <= LANES, "layer width > 128 lanes not supported by slab packing"

    # layer_business ++ layer_ethics_E fused into a single matmul weight.
    w_be = jnp.concatenate([w_bus, w_E], axis=1)

    blocks = [w_in, w_out, w_be, w_A]
    row_offs, off = [], 0
    for w in blocks:
        row_offs.append(off)
        off += _round_up(w.shape[0], 16)          # bf16 sublane packing = 16 rows
    total_rows = _round_up(off, 16)

    w_slab = jnp.zeros((total_rows, LANES), jnp.bfloat16)
    for r0, w in zip(row_offs, blocks):
        w_slab = w_slab.at[r0:r0 + w.shape[0], :w.shape[1]].set(
            w.astype(jnp.bfloat16))

    b_be = jnp.concatenate([params["b_bus"].reshape(-1),
                            params["b_E"].reshape(-1)])
    bias_rows = [params["b_in"].reshape(-1), params["b_out"].reshape(-1),
                 b_be, params["b_A"].reshape(-1)]
    bias_pack = jnp.zeros((8, LANES), jnp.float32)
    for r, b in enumerate(bias_rows):
        assert b.shape[0] <= LANES
        bias_pack = bias_pack.at[r, :b.shape[0]].set(b.astype(jnp.float32))

    dims = dict(D_in=D_in, h1=h1, h2=h2, o_bus=o_bus, o_E=o_E, o_A=o_A)
    return dict(w_slab=w_slab, bias_pack=bias_pack,
                row_offs=tuple(row_offs), dims=dims)


# --------------------------------------------------------------------------- #
# Wrappers
# --------------------------------------------------------------------------- #
def model_ethics_forward_packed(x, packed, *, tm_cap=1024):
    """x: [B, D_in] f32 or bf16 (bf16 halves the input DMA bytes).
    Returns the lane-dense packed output [x1 | x2 | x3] of shape
    (B, o_bus + o_E + o_A); split it inside the consumer's jit."""
    B, D_in = x.shape
    d = packed["dims"]
    assert D_in == d["D_in"]
    h1, h2 = d["h1"], d["h2"]
    o_bus, o_E, o_A = d["o_bus"], d["o_E"], d["o_A"]
    o_total = o_bus + o_E + o_A
    w_slab, bias_pack = packed["w_slab"], packed["bias_pack"]

    # Batch tile: large (kernel is step-overhead / DMA bound; VMEM is a
    # non-issue on v5e/v6e/v7x even double-buffered), clamped so the grid has
    # >= 2 steps whenever B allows, so ("parallel",) can use both v7x TCs.
    # tm_cap is worth sweeping in {512, 1024, 2048} for very large B.
    half = _round_up(pl.cdiv(B, 2), 8)
    TM = max(8, min(tm_cap, half))
    grid = (pl.cdiv(B, TM),)

    kernel = make_enn_kernel(D_in, h1, h2, o_bus, o_E, o_A, packed["row_offs"])
    resident = lambda i: (0, 0)   # weights/biases: constant block -> VMEM resident

    flops = 2 * B * (D_in * h1 + h1 * h2 + h2 * (o_bus + o_E)
                     + (o_bus + o_E) * o_A)
    bytes_accessed = (x.size * x.dtype.itemsize
                      + w_slab.size * 2 + bias_pack.size * 4
                      + B * o_total * 4)

    return pl.pallas_call(
        kernel,
        out_shape=jax.ShapeDtypeStruct((B, o_total), jnp.float32),
        grid=grid,
        in_specs=[
            pl.BlockSpec((TM, D_in), lambda i: (i, 0)),   # x: tiled over batch
            pl.BlockSpec(w_slab.shape, resident),
            pl.BlockSpec(bias_pack.shape, resident),
        ],
        out_specs=pl.BlockSpec((TM, o_total), lambda i: (i, 0)),
        compiler_params=pltpu.CompilerParams(
            dimension_semantics=("parallel",)),
        cost_estimate=pl.CostEstimate(flops=int(flops), transcendentals=0,
                                      bytes_accessed=int(bytes_accessed)),
    )(x, w_slab, bias_pack)


def model_ethics_forward(x, packed):
    """Compatibility wrapper: returns (x1, x2, x3) like the PyTorch module.
    NOTE: these slices are separate XLA copies of the output slab; prefer
    model_ethics_forward_packed() and splitting inside the consumer's jit."""
    out = model_ethics_forward_packed(x, packed)
    d = packed["dims"]
    o_bus, o_E = d["o_bus"], d["o_E"]
    return out[:, :o_bus], out[:, o_bus:o_bus + o_E], out[:, o_bus + o_E:]


# --------------------------------------------------------------------------- #
# Init / reference
# --------------------------------------------------------------------------- #
def xavier_uniform(key, fan_in, fan_out):
    limit = (6.0 / (fan_in + fan_out)) ** 0.5
    # PyTorch weight is [out, in]; we store the transpose [in, out], in bf16.
    return jax.random.uniform(key, (fan_in, fan_out), jnp.float32,
                              -limit, limit).astype(jnp.bfloat16)


def init_params(key, input_sizes, output_sizes):
    ks = jax.random.split(key, 5)
    names = ["in", "out", "bus", "E", "A"]
    params = {}
    for k, name, fi, fo in zip(ks, names, input_sizes, output_sizes):
        params[f"w_{name}"] = xavier_uniform(k, fi, fo)
        params[f"b_{name}"] = jnp.zeros((1, fo), jnp.float32)  # constant_(bias, 0)
    return params


def reference_forward(x, params):
    """Pure-JAX reference using the same bf16 weights (upcast to f32)."""
    relu = lambda v: jnp.maximum(v, 0.0)
    f = lambda w: w.astype(jnp.float32)
    h = relu(x @ f(params["w_in"]) + params["b_in"])
    x0 = relu(h @ f(params["w_out"]) + params["b_out"])
    x1 = x0 @ f(params["w_bus"]) + params["b_bus"]
    x2 = relu(x0 @ f(params["w_E"]) + params["b_E"])
    xc = jnp.concatenate([x1, x2], axis=1)
    x3 = xc @ f(params["w_A"]) + params["b_A"]
    return x1, x2, x3


# --------------------------------------------------------------------------- #
# Demo / self-test
# --------------------------------------------------------------------------- #
if __name__ == "__main__":
    # Shapes consistent with the module's chained Linear layers:
    # input_sizes[1] == output_sizes[0], input_sizes[2] == input_sizes[3] ==
    # output_sizes[1], input_sizes[4] == output_sizes[2] + output_sizes[3].
    input_sizes = [32, 64, 48, 48, 48]
    output_sizes = [64, 48, 32, 16, 8]
    dropout_rate = 0.1  # TODO(synk): dropout is identity here (inference mode)

    B = 8
    key = jax.random.PRNGKey(0)
    k_x, k_p, k_b = jax.random.split(key, 3)
    x = jax.random.normal(k_x, (B, input_sizes[0]), jnp.float32)
    params = init_params(k_p, input_sizes, output_sizes)

    # Give the biases small non-zero values so the bias path is actually tested
    # (the module inits them to 0; forward semantics are unchanged).
    for i, (name, fo) in enumerate(zip(["b_in", "b_out", "b_bus", "b_E", "b_A"],
                                       output_sizes)):
        params[name] = 0.1 * jax.random.normal(jax.random.fold_in(k_b, i),
                                               (1, fo), jnp.float32)

    packed = prepare_params(params)   # fuse + pack once, reuse every call

    x1, x2, x3 = model_ethics_forward(x, packed)
    jax.block_until_ready((x1, x2, x3))

    r1, r2, r3 = reference_forward(x, params)
    assert jnp.allclose(x1, r1, atol=5e-2, rtol=5e-2), "x1 mismatch"
    assert jnp.allclose(x2, r2, atol=5e-2, rtol=5e-2), "x2 mismatch"
    assert jnp.allclose(x3, r3, atol=5e-2, rtol=5e-2), "x3 mismatch"

    print("KERNEL_OK")
</pallas_src>

<mosaic_0001>
module attributes {stable_mosaic.version = 11 : i64} {
  func.func @kernel(%arg0: i32, %arg1: memref<8x32xf32, #tpu.memory_space<vmem>>, %arg2: memref<192x128xbf16, #tpu.memory_space<vmem>>, %arg3: memref<8x128xf32, #tpu.memory_space<vmem>>, %arg4: memref<8x56xf32, #tpu.memory_space<vmem>>) attributes {dimension_semantics = [#tpu.dimension_semantics<parallel>], iteration_bounds = array<i64: 1>, scalar_prefetch = 0 : i64, scratch_operands = 0 : i64, tpu.core_type = #tpu.core_type<tc>, window_params = [{transform_indices = @transform_0, window_bounds = array<i64: 8, 32>}, {pipeline_mode = #tpu.pipeline_mode<synchronous>, transform_indices = @transform_1, window_bounds = array<i64: 192, 128>}, {pipeline_mode = #tpu.pipeline_mode<synchronous>, transform_indices = @transform_2, window_bounds = array<i64: 8, 128>}, {transform_indices = @transform_3, window_bounds = array<i64: 8, 56>}]} {
    %c0 = arith.constant 0 : index
    %c0_0 = arith.constant 0 : index
    %0 = vector.load %arg1[%c0, %c0_0] : memref<8x32xf32, #tpu.memory_space<vmem>>, vector<8x32xf32>
    %1 = arith.truncf %0 : vector<8x32xf32> to vector<8x32xbf16>
    %c0_1 = arith.constant 0 : index
    %c0_2 = arith.constant 0 : index
    %2 = vector.load %arg2[%c0_1, %c0_2] : memref<192x128xbf16, #tpu.memory_space<vmem>>, vector<32x64xbf16>
    %c32 = arith.constant 32 : index
    %c0_3 = arith.constant 0 : index
    %3 = vector.load %arg2[%c32, %c0_3] : memref<192x128xbf16, #tpu.memory_space<vmem>>, vector<64x48xbf16>
    %c96 = arith.constant 96 : index
    %c0_4 = arith.constant 0 : index
    %4 = vector.load %arg2[%c96, %c0_4] : memref<192x128xbf16, #tpu.memory_space<vmem>>, vector<48x48xbf16>
    %c144 = arith.constant 144 : index
    %c0_5 = arith.constant 0 : index
    %5 = vector.load %arg2[%c144, %c0_5] : memref<192x128xbf16, #tpu.memory_space<vmem>>, vector<48x8xbf16>
    %c0_6 = arith.constant 0 : index
    %c0_7 = arith.constant 0 : index
    %6 = vector.load %arg3[%c0_6, %c0_7] : memref<8x128xf32, #tpu.memory_space<vmem>>, vector<1x64xf32>
    %c1 = arith.constant 1 : index
    %c0_8 = arith.constant 0 : index
    %7 = vector.load %arg3[%c1, %c0_8] : memref<8x128xf32, #tpu.memory_space<vmem>>, vector<1x48xf32>
    %c2 = arith.constant 2 : index
    %c0_9 = arith.constant 0 : index
    %8 = vector.load %arg3[%c2, %c0_9] : memref<8x128xf32, #tpu.memory_space<vmem>>, vector<1x48xf32>
    %c3 = arith.constant 3 : index
    %c0_10 = arith.constant 0 : index
    %9 = vector.load %arg3[%c3, %c0_10] : memref<8x128xf32, #tpu.memory_space<vmem>>, vector<1x8xf32>
    %cst = arith.constant dense<0.000000e+00> : vector<8x64xf32>
    %10 = tpu.matmul %1, %2, %cst {dimension_numbers = #tpu.dot_dimension_numbers<[1], [0], [0], [1], [0, 0, 1, 1], [], []>} : vector<8x32xbf16>, vector<32x64xbf16>, vector<8x64xf32> -> vector<8x64xf32>
    %11 = vector.broadcast %6 : vector<1x64xf32> to vector<8x64xf32>
    %12 = arith.addf %10, %11 : vector<8x64xf32>
    %cst_11 = arith.constant 0.000000e+00 : f32
    %13 = vector.broadcast %cst_11 : f32 to vector<8x64xf32>
    %14 = arith.maximumf %12, %13 : vector<8x64xf32>
    %15 = arith.truncf %14 : vector<8x64xf32> to vector<8x64xbf16>
    %cst_12 = arith.constant dense<0.000000e+00> : vector<8x48xf32>
    %16 = tpu.matmul %15, %3, %cst_12 {dimension_numbers = #tpu.dot_dimension_numbers<[1], [0], [0], [1], [0, 0, 1, 1], [], []>} : vector<8x64xbf16>, vector<64x48xbf16>, vector<8x48xf32> -> vector<8x48xf32>
    %17 = vector.broadcast %7 : vector<1x48xf32> to vector<8x48xf32>
    %18 = arith.addf %16, %17 : vector<8x48xf32>
    %cst_13 = arith.constant 0.000000e+00 : f32
    %19 = vector.broadcast %cst_13 : f32 to vector<8x48xf32>
    %20 = arith.maximumf %18, %19 : vector<8x48xf32>
    %21 = arith.truncf %20 : vector<8x48xf32> to vector<8x48xbf16>
    %cst_14 = arith.constant dense<0.000000e+00> : vector<8x48xf32>
    %22 = tpu.matmul %21, %4, %cst_14 {dimension_numbers = #tpu.dot_dimension_numbers<[1], [0], [0], [1], [0, 0, 1, 1], [], []>} : vector<8x48xbf16>, vector<48x48xbf16>, vector<8x48xf32> -> vector<8x48xf32>
    %23 = vector.broadcast %8 : vector<1x48xf32> to vector<8x48xf32>
    %24 = arith.addf %22, %23 : vector<8x48xf32>
    %25 = tpu.iota {dimensions = array<i32: 1>} : vector<8x48xi32>
    %c32_i32 = arith.constant 32 : i32
    %26 = vector.broadcast %c32_i32 : i32 to vector<8x48xi32>
    %27 = arith.cmpi sge, %25, %26 : vector<8x48xi32>
    %cst_15 = arith.constant 0.000000e+00 : f32
    %28 = vector.broadcast %cst_15 : f32 to vector<8x48xf32>
    %29 = arith.maximumf %24, %28 : vector<8x48xf32>
    %30 = arith.select %27, %29, %24 : vector<8x48xi1>, vector<8x48xf32>
    %31 = arith.truncf %30 : vector<8x48xf32> to vector<8x48xbf16>
    %cst_16 = arith.constant dense<0.000000e+00> : vector<8x8xf32>
    %32 = tpu.matmul %31, %5, %cst_16 {dimension_numbers = #tpu.dot_dimension_numbers<[1], [0], [0], [1], [0, 0, 1, 1], [], []>} : vector<8x48xbf16>, vector<48x8xbf16>, vector<8x8xf32> -> vector<8x8xf32>
    %33 = vector.broadcast %9 : vector<1x8xf32> to vector<8x8xf32>
    %34 = arith.addf %32, %33 : vector<8x8xf32>
    %c0_17 = arith.constant 0 : index
    %c0_18 = arith.constant 0 : index
    %35 = vector.load %arg4[%c0_17, %c0_18] : memref<8x56xf32, #tpu.memory_space<vmem>>, vector<8x48xf32>
    tpu.vector_store %arg4[%c0_17, %c0_18], %30 {strides = array<i32>} : memref<8x56xf32, #tpu.memory_space<vmem>>, vector<8x48xf32>,
    %c0_19 = arith.constant 0 : index
    %c48 = arith.constant 48 : index
    %36 = vector.load %arg4[%c0_19, %c48] : memref<8x56xf32, #tpu.memory_space<vmem>>, vector<8x8xf32>
    tpu.vector_store %arg4[%c0_19, %c48], %34 {strides = array<i32>} : memref<8x56xf32, #tpu.memory_space<vmem>>, vector<8x8xf32>,
    return
  }
  func.func @transform_0(%arg0: i32) -> (i32, i32) {
    %c0_i32 = arith.constant 0 : i32
    %c0_i32_0 = arith.constant 0 : i32
    return %arg0, %c0_i32 : i32, i32
  }
  func.func @transform_1(%arg0: i32) -> (i32, i32) {
    %c0_i32 = arith.constant 0 : i32
    %c0_i32_0 = arith.constant 0 : i32
    %c0_i32_1 = arith.constant 0 : i32
    return %c0_i32, %c0_i32_0 : i32, i32
  }
  func.func @transform_2(%arg0: i32) -> (i32, i32) {
    %c0_i32 = arith.constant 0 : i32
    %c0_i32_0 = arith.constant 0 : i32
    %c0_i32_1 = arith.constant 0 : i32
    return %c0_i32, %c0_i32_0 : i32, i32
  }
  func.func @transform_3(%arg0: i32) -> (i32, i32) {
    %c0_i32 = arith.constant 0 : i32
    %c0_i32_0 = arith.constant 0 : i32
    return %arg0, %c0_i32 : i32, i32
  }
}

</mosaic_0001>

<bundles_post_ra>
// kernel: tpu_custom_call.1
= control target key start
LH: loop header
LB: loop body
LE: loop exit
PB: predicated region body
PF: predicated region fallthrough
CT: control target
= control target key end

     0   :  { %8 = vsyncpa [#allocation3], 0  ;;  %s654_s0 = inlined_call_operand.hbm [shape: f32[8,32], index: 0, kind: input, shape index: {}]   ;;  %s655_s1 = inlined_call_operand.hbm [shape: bf16[192,128], index: 1, kind: input, shape index: {}]   ;;  %s656_s2 = inlined_call_operand.hbm [shape: f32[8,128], index: 2, kind: input, shape index: {}]   ;;  %s657_s3 = inlined_call_operand.hbm [shape: f32[8,56], index: 3, kind: output, shape index: {}]  }
   0x1   :  { %9 = vsyncpa [#allocation6], 0 }
   0x2   :  { %10 = vsyncpa [#allocation4], 0  ;;  %s570_s12 = smov [#allocation5]   ;;  %s476_s16 = scalar_lea.hbm %s655_s1, 1536 }
   0x3   :  { %s26_s13 = sshll.u32 %s570_s12, 4  ;;  %p477_p0 = scmp.ne.s32.totalorder %s655_s1, %s476_s16  ;;  %s27_s13 = int_to_ptr.vmem [resolvable:$true] %s26_s13 }
   0x4   :  { %p480_p1 = scmp.lt.u32.totalorder %s476_s16, %s655_s1 }
   0x6   :  { %p482_p2 = pnand %p480_p1, %p477_p0 }
   0x8   :  { %485 = shalt.err (!%p482_p2)
}
   0x9   :  { %s486_s21 = scalar_lea.vmem %s27_s13, 1536  ;;  %p491_p4 = scmp.lt.s32.totalorder %s27_s13, %s27_s13 }
   0xa   :  { %p487_p3 = scmp.ne.s32.totalorder %s27_s13, %s486_s21  ;;  %p492_p5 = scmp.lt.s32.totalorder %s486_s21, %s486_s21 }
   0xc   :  { %p493_p6 = por %p492_p5, %p491_p4 }
   0xe   :  { %p494_p7 = pnand %p493_p6, %p487_p3 }
  0x10   :  { %497 = shalt.err (!%p494_p7)
}
  0x11   :  { %s571_s22 = smov 64   ;;  %s572_s23 = smov 4  }
  0x12   :  { %32 = dma.hbm_to_vmem [thread:$0]  %s655_s1, 1536, %s27_s13, [#allocation6], %s571_s22, %s571_s22, %s572_s23  }
  0x13   :  { %s573_s26 = smov [#allocation2]   ;;  %s574_s28 = smov [#allocation7]  }
  0x14   :  { %s17_s27 = sshll.u32 %s573_s26, 4  ;;  %s39_s29 = sshll.u32 %s574_s28, 4  ;;  %s18_s27 = int_to_ptr.vmem [resolvable:$true] %s17_s27  ;;  %s40_s29 = int_to_ptr.vmem [resolvable:$true] %s39_s29 }
  0x15   :  { %s498_s5 = scalar_lea.hbm %s654_s0, 128 }
  0x16   :  { %p499_p8 = scmp.ne.s32.totalorder %s654_s0, %s498_s5  ;;  %p502_p9 = scmp.lt.u32.totalorder %s498_s5, %s654_s0 }
  0x18   :  { %p504_p10 = pnand %p502_p9, %p499_p8 }
  0x1a   :  { %507 = shalt.err (!%p504_p10)
}
  0x1b   :  { %s508_s1 = scalar_lea.vmem %s18_s27, 128  ;;  %p513_p12 = scmp.lt.s32.totalorder %s18_s27, %s18_s27 }
  0x1c   :  { %p509_p11 = scmp.ne.s32.totalorder %s18_s27, %s508_s1  ;;  %p514_p13 = scmp.lt.s32.totalorder %s508_s1, %s508_s1 }
  0x1e   :  { %p515_p0 = por %p514_p13, %p513_p12 }
  0x20   :  { %p516_p1 = pnand %p515_p0, %p509_p11 }
  0x22   :  { %519 = shalt.err (!%p516_p1)
}
  0x23   :  { %20 = dma.hbm_to_vmem [thread:$0]  %s654_s0, 128, %s18_s27, [#allocation3]  }
  0x24   :  { %s520_s14 = scalar_lea.hbm %s656_s2, 128 }
  0x25   :  { %p521_p2 = scmp.ne.s32.totalorder %s656_s2, %s520_s14  ;;  %p524_p3 = scmp.lt.u32.totalorder %s520_s14, %s656_s2 }
  0x27   :  { %p526_p4 = pnand %p524_p3, %p521_p2 }
  0x29   :  { %529 = shalt.err (!%p526_p4)
}
  0x2a   :  { %s530_s19 = scalar_lea.vmem %s40_s29, 128  ;;  %p535_p6 = scmp.lt.s32.totalorder %s40_s29, %s40_s29 }
  0x2b   :  { %p531_p5 = scmp.ne.s32.totalorder %s40_s29, %s530_s19  ;;  %p536_p7 = scmp.lt.s32.totalorder %s530_s19, %s530_s19 }
  0x2d   :  { %p537_p8 = por %p536_p7, %p535_p6 }
  0x2f   :  { %p538_p9 = pnand %p537_p8, %p531_p5 }
  0x31   :  { %541 = shalt.err (!%p538_p9)
}
  0x32   :  { %42 = dma.hbm_to_vmem [thread:$0]  %s656_s2, 128, %s40_s29, [#allocation6]  }
  0x33   :  { %564 = dma.done.wait [#allocation3], 128  }
  0x34   :  { %565 = vsyncadd [#allocation3], 4294967168 }
  0x35   :  { %566 = dma.done.wait [#allocation6], 1664  }
  0x36   :  { %567 = vsyncadd [#allocation6], 4294965632  ;;  %v575_v0 = vmov 0.0   ;;  %vm576_vm0 = vmmov 0   ;;  %v464_v1 = vld [vmem:[#allocation5] sm:$0xff]   ;;  %v465_v2 = vld [vmem:[#allocation5 + $0x8] sm:$0xff]   ;;  %v285_v31 = vlaneseq }
  0x37   :  { %415 = vmatprep.subr.bf16.mxu0 %v575_v0  ;;  %419 = vmatprep.mubr.msk.bf16.mxu0 %vm576_vm0, %v575_v0  ;;  %v53_v3 = vld [vmem:[#allocation2] sm:$0xff]  ;;  %v466_v4 = vld [vmem:[#allocation5 + $0x10] sm:$0xff]   ;;  %vm99_vm1 = vcmask 261120   ;;  %v468_v7 = vld [vmem:[#allocation5 + $0x20] sm:$0xff]   ;;  %vm173_vm2 = vcmask 523264   ;;  %vm241_vm3 = vcmask 392192  }
  0x38   :  { %423 = vmatprep.subr.bf16.mxu1 %v575_v0  ;;  %431 = vmatprep.mubr.msk.bf16.mxu1 %vm576_vm0, %v575_v0  ;;  %v467_v5 = vld [vmem:[#allocation5 + $0x18] sm:$0xff]   ;;  %v54_v6 = vpack.c.bf16 %v53_v3, %v53_v3  ;;  %v469_v8 = vld [vmem:[#allocation5 + $0x28] sm:$0xff]   ;;  %v470_v9 = vld [vmem:[#allocation5 + $0x30] sm:$0xff]   ;;  %v286_v33 = vand.u32 127, %v285_v31  ;;  %s577_s2 = smov 48   ;;  %s578_s21 = smov [#allocation8]  }
  0x39   :  { %416 = vmatpush3.bf16.msra.mxu0 %v464_v1  ;;  %424 = vmatpush3.bf16.msra.mxu1 %v466_v4  ;;  %v379_v10 = vld [vmem:[#allocation7] ss:$0 sm:$0xff]  ;;  %v471_v18 = vld [vmem:[#allocation5 + $0x38] sm:$0xff]   ;;  %v473_v20 = vld [vmem:[#allocation5 + $0x48] sm:$0xff]   ;;  %s369_s22 = sshll.u32 %s578_s21, 4  ;;  %vm361_vm5 = vcmask 458112   ;;  %s370_s22 = int_to_ptr.vmem [resolvable:$true] %s369_s22 }
  0x3a   :  { %417 = vmatprep.subr.bf16.mxu0 %v575_v0  ;;  %425 = vmatprep.subr.bf16.mxu1 %v575_v0  ;;  %v472_v19 = vld [vmem:[#allocation5 + $0x40] sm:$0xff]   ;;  %v474_v29 = vld [vmem:[#allocation5 + $0x50] sm:$0xff]   ;;  %v475_v30 = vld [vmem:[#allocation5 + $0x58] sm:$0xff]   ;;  %vm287_vm4 = vcmp.ge.s32.totalorder %v286_v33, 32  ;;  %s542_s23 = scalar_lea.vmem %s370_s22, 128  ;;  %p547_p11 = scmp.lt.s32.totalorder %s370_s22, %s370_s22 }
  0x3b   :  { %v383_v21 = vld [vmem:[#allocation7 + $0x1] ss:$0 sm:$0xff]  ;;  %v389_v32 = vld [vmem:[#allocation7 + $0x2] ss:$0 sm:$0xff]  ;;  %v394_v42 = vld [vmem:[#allocation7 + $0x3] ss:$0 sm:$0xff]  ;;  %p543_p10 = scmp.ne.s32.totalorder %s370_s22, %s542_s23  ;;  %p548_p12 = scmp.lt.s32.totalorder %s542_s23, %s542_s23 }
  0x3d   :  { %418 = vmatpush3.bf16.msra.mxu0 %v465_v2  ;;  %426 = vmatpush3.bf16.msra.mxu1 %v467_v5  ;;  %p549_p13 = por %p548_p12, %p547_p11 }
  0x3e   :  { %435 = vmatprep.subr.bf16.mxu0 %v575_v0  ;;  %427 = vmatprep.subr.bf16.mxu1 %v575_v0 }
  0x3f   :  { %p550_p0 = pnand %p549_p13, %p543_p10 }
  0x40   :  { %420 = vmatmul.mubr.msk.bf16.vlgmr.msra.gmra.mrb[0].mxu0 %vm99_vm1, %v54_v6 }
  0x41   :  { %441 = vmatprep.mubr.msk.bf16.mxu0 %vm576_vm0, %v575_v0  ;;  %428 = vmatpush3.bf16.msra.mxu1 %v468_v7 }
  0x42   :  { %429 = vmatprep.subr.bf16.mxu1 %v575_v0  ;;  %436 = vmatpush3.bf16.msra.mxu0 %v470_v9 }
  0x43   :  { %437 = vmatprep.subr.bf16.mxu0 %v575_v0 }
  0x45   :  { %430 = vmatpush3.bf16.msra.mxu1 %v469_v8 }
  0x46   :  { %445 = vmatprep.subr.bf16.mxu1 %v575_v0  ;;  %438 = vmatpush3.bf16.msra.mxu0 %v471_v18 }
  0x47   :  { %439 = vmatprep.subr.bf16.mxu0 %v575_v0 }
  0x4a   :  { %440 = vmatpush3.bf16.msra.mxu0 %v472_v19 }
 0x113   :  { %v137_v11 = vpop.f32.mrb[0].mxu0 }
 0x114   :  { %v138_v12 = vadd.f32 %v379_v10, %v137_v11  ;;  %v421_v13 = vpop.f32.mrb[1].mxu0 }
 0x115   :  { %v140_v14 = vpop.f32.mrb[2].mxu0 }
 0x116   :  { %v143_v15 = vmax.f32 %v138_v12, 0.0  ;;  %v422_v16 = vpop.f32.mrb[3].mxu0 }
 0x118   :  { %v144_v17 = vpack.c.bf16 %v143_v15, %v143_v15 }
 0x11a   :  { %432 = vmatmul.mubr.msk.bf16.vlgmr.msra.gmra.mrb[0].mxu1 %vm173_vm2, %v144_v17 }
 0x11b   :  { %451 = vmatprep.mubr.msk.bf16.mxu1 %vm576_vm0, %v575_v0  ;;  %446 = vmatpush3.bf16.msra.mxu1 %v473_v20 }
 0x11c   :  { %447 = vmatprep.subr.bf16.mxu1 %v575_v0 }
 0x11f   :  { %448 = vmatpush3.bf16.msra.mxu1 %v474_v29 }
 0x120   :  { %449 = vmatprep.subr.bf16.mxu1 %v575_v0 }
 0x123   :  { %450 = vmatpush3.bf16.msra.mxu1 %v475_v30 }
 0x1ed   :  { %v211_v22 = vpop.f32.mrb[0].mxu1 }
 0x1ee   :  { %v212_v23 = vadd.f32 %v383_v21, %v211_v22  ;;  %v433_v24 = vpop.f32.mrb[1].mxu1 }
 0x1ef   :  { %v214_v25 = vpop.f32.mrb[2].mxu1 }
 0x1f0   :  { %v217_v26 = vmax.f32 %v212_v23, 0.0  ;;  %v434_v27 = vpop.f32.mrb[3].mxu1 }
 0x1f2   :  { %v218_v28 = vpack.c.bf16 %v217_v26, %v217_v26 }
 0x1f4   :  { %442 = vmatmul.mubr.msk.bf16.vlgmr.msra.gmra.mrb[4].mxu0 %vm241_vm3, %v218_v28 }
 0x2c7   :  { %v279_v34 = vpop.f32.mrb[4].mxu0 }
 0x2c8   :  { %v280_v35 = vadd.f32 %v389_v32, %v279_v34  ;;  %v443_v36 = vpop.f32.mrb[5].mxu0 }
 0x2c9   :  { %v282_v37 = vpop.f32.mrb[6].mxu0 }
 0x2ca   :  { %v288_v38 = vmax.f32 %v280_v35, 0.0  ;;  %v444_v39 = vpop.f32.mrb[7].mxu0 }
 0x2cc   :  { %v289_v40 = vsel %vm287_vm4, %v288_v38, %v280_v35 }
 0x2cd   :  { %v290_v41 = vpack.c.bf16 %v289_v40, %v289_v40  ;;  %356 = vst.msk [vmem:[#allocation8] sm:$0xff] %vm241_vm3, %v289_v40 }
 0x2cf   :  { %452 = vmatmul.mubr.msk.bf16.vlgmr.msra.gmra.mrb[4].mxu1 %vm241_vm3, %v290_v41 }
 0x3a2   :  { %v350_v43 = vpop.f32.mrb[4].mxu1 }
 0x3a3   :  { %v351_v44 = vadd.f32 %v394_v42, %v350_v43  ;;  %v453_v45 = vpop.f32.mrb[5].mxu1 }
 0x3a4   :  { %v353_v46 = vpop.f32.mrb[6].mxu1 }
 0x3a5   :  { %v454_v47 = vpop.f32.mrb[7].mxu1  ;;  %358 = vrot.lane.b32.xlu0 %v351_v44, %s577_s2 }
 0x417   :  { %v359_v48 = vpop.permute.xlu0 %358 }
 0x418   :  { %362 = vst.msk [vmem:[#allocation8] sm:$0xff] %vm361_vm5, %v359_v48 }
 0x419   :  { %553 = shalt.err (!%p550_p0)
}
 0x41a   :  { %s554_s26 = scalar_lea.hbm %s657_s3, 128 }
 0x41b   :  { %p555_p1 = scmp.ne.s32.totalorder %s657_s3, %s554_s26  ;;  %p558_p2 = scmp.lt.u32.totalorder %s554_s26, %s657_s3 }
 0x41d   :  { %p560_p3 = pnand %p558_p2, %p555_p1 }
 0x41f   :  { %563 = shalt.err (!%p560_p3)
}
 0x420   :  { %372 = dma.vmem_to_hbm [thread:$0]  %s370_s22, 128, %s657_s3, [#allocation4]  }
 0x421   :  { %568 = dma.done.wait [#allocation4], 128  }
 0x422   :  { %569 = vsyncadd [#allocation4], 4294967168 }
 0x423   :  { %376 = vsyncpa [#allocation3], 1 }
 0x424   :  { %377 = vsyncpa [#allocation6], 1 }
 0x425   :  { %378 = vsyncpa [#allocation4], 1 }

</bundles_post_ra>
